<compile_context>
chip_gen: v7x
topology: tpu7x:2x2x1
jax: 0.10.0
libtpu: 0.0.40
codegen_flags: <defaults>
</compile_context>

<pallas_src>
import functools

import jax
import jax.numpy as jnp
from jax.experimental import pallas as pl
from jax.experimental.pallas import tpu as pltpu

_MiB = 1024 * 1024


def _round_up(x, m):
    return ((x + m - 1) // m) * m


@functools.lru_cache(maxsize=1)
def _chip_info():
    """Returns (vmem_capacity_bytes, num_tensorcores_per_chip, mxu_align)."""
    kind = ""
    try:
        kind = jax.devices()[0].device_kind.lower()
    except Exception:
        pass
    is_v7 = "7" in kind
    mxu_align = 256 if (is_v7 or "v6" in kind) else 128
    vmem_cap = 64 * _MiB if is_v7 else 128 * _MiB
    try:
        cap = int(getattr(pltpu.get_tpu_info(), "vmem_capacity_bytes", vmem_cap))
        if 16 * _MiB <= cap <= 1024 * _MiB:
            vmem_cap = cap
    except Exception:
        pass
    if is_v7:
        vmem_cap = min(vmem_cap, 64 * _MiB)   # per-TensorCore VMEM on v7x
    num_tc = 2 if (is_v7 or vmem_cap <= 64 * _MiB) else 1
    return vmem_cap, num_tc, mxu_align


def _tile_budget(vmem_cap):
    # Resident-tile budget (everything the kernel keeps live at once).
    # 64-MiB-VMEM chips (v7x): ~26 MiB; 128-MiB chips (v5e/v6e): up to 48 MiB
    # (enables weight-stationary).  vmem_limit_bytes is raised to cover it.
    return 26 * _MiB if vmem_cap <= 64 * _MiB else 48 * _MiB


# --------------------------------------------------------------------------
# Kernels
# --------------------------------------------------------------------------
def _fce_kernel(x_ref, w_ref, shift_ref, o_ref):
    # x_ref:     (TB, K)   input tile in its native dtype (cast on the VPU here,
    #                      hidden under the MXU, instead of a wrapper HBM pass)
    # w_ref:     (K, TN)   bf16 BN-scaled transposed weight tile
    # shift_ref: (1, TN)   f32 folded shift (bias/mean/beta)
    x = x_ref[...].astype(w_ref.dtype)
    y = jnp.dot(x, w_ref[...], preferred_element_type=jnp.float32)
    o_ref[...] = jnp.maximum(y + shift_ref[...], 0.0).astype(o_ref.dtype)


def _fce_kernel_ksplit(x_ref, w_ref, shift_ref, o_ref, acc_ref):
    # Same as above but with a K-reduction grid axis (axis 2, "arbitrary") and
    # an f32 VMEM accumulator; used only for very large nin.
    k = pl.program_id(2)

    @pl.when(k == 0)
    def _():
        acc_ref[...] = jnp.zeros_like(acc_ref)

    x = x_ref[...].astype(w_ref.dtype)
    acc_ref[...] += jnp.dot(x, w_ref[...], preferred_element_type=jnp.float32)

    @pl.when(k == pl.num_programs(2) - 1)
    def _():
        o_ref[...] = jnp.maximum(acc_ref[...] + shift_ref[...],
                                 0.0).astype(o_ref.dtype)


# --------------------------------------------------------------------------
# One-time parameter preparation (cache the result; weights / running stats
# are static in eval mode, so none of this is per-forward cost).
# --------------------------------------------------------------------------
def prepare_fully_connected_embed(weight, bias, gamma, beta, running_mean,
                                  running_var, eps=1e-5,
                                  compute_dtype=jnp.bfloat16):
    """Folds BatchNorm1d (eval, running stats) + linear bias into the weight.

    weight: (nout, nin).  Returns a dict of device arrays plus static plan
    entries (keep the static ints static if you jit the apply function).
    """
    nout, nin = weight.shape
    f32 = jnp.float32
    vmem_cap, _, mxu_align = _chip_info()
    budget = _tile_budget(vmem_cap)

    inv_std = 1.0 / jnp.sqrt(running_var.astype(f32) + eps)
    scale = gamma.astype(f32) * inv_std                                # (nout,)
    shift = beta.astype(f32) + (bias.astype(f32) - running_mean.astype(f32)) * scale

    # Fold the BN scale into the weight columns (done once, free per forward)
    # -> the kernel epilogue is just `+ shift; relu`.
    wt = weight.T.astype(f32) * scale[None, :]                         # (nin, nout)

    # Lane-dense output: multiple of 128; prefer a multiple of 256 on
    # 256-wide-MXU chips once nout is already past 256 (bigger uniform blocks).
    nout_p = _round_up(nout, 128)
    if mxu_align == 256 and nout_p > 256:
        nout_p = _round_up(nout_p, 256)

    # Decide the K (=nin) tiling once, since the weight's K padding is cached.
    w_bytes = nin * nout_p * 2
    ws_foot = w_bytes + 2 * 128 * nin * 4 + 2 * 128 * nout_p * 4       # weight-stationary
    fullk_foot = (2 * 256 * nin * 4 + 2 * nin * min(nout_p, 256) * 2
                  + 2 * 256 * min(nout_p, 256) * 4)                    # streamed, full K
    if ws_foot <= budget or fullk_foot <= budget:
        block_k = nin                       # whole reduction dim in one block
    else:
        # K-reduction grid axis needed (huge nin AND large nout).
        per_k = 2 * 256 * 4 + 2 * 256 * 2   # x + W bytes per K element (block_b=block_n=256)
        bk = max(128, min(4096, (budget - 2 * _MiB) // per_k))
        block_k = (bk // 128) * 128
    nin_p = _round_up(nin, block_k)

    if nin_p != nin or nout_p != nout:
        wt = jnp.pad(wt, ((0, nin_p - nin), (0, nout_p - nout)))
        shift = jnp.pad(shift, (0, nout_p - nout))
    wt = wt.astype(compute_dtype)
    shift2d = shift.reshape(1, nout_p)

    weight_resident = (block_k == nin) and (ws_foot <= budget)
    return dict(wt=wt, shift=shift2d, nin=nin, nout=nout, nin_p=nin_p,
                nout_p=nout_p, block_k=block_k, weight_resident=weight_resident)


# --------------------------------------------------------------------------
# Forward
# --------------------------------------------------------------------------
def fully_connected_embed_apply(x, params, out_dtype=jnp.bfloat16):
    """Eval-mode FullyConnectedEmbed forward: relu(BN(x @ W.T + b)); dropout=id.

    x: (B, nin) in its native dtype (no wrapper cast).  Returns (B, nout).
    """
    B, nin = x.shape
    if nin != params["nin"]:
        raise ValueError(f"expected nin={params['nin']}, got {nin}")
    wt, shift = params["wt"], params["shift"]
    nin_p, nout_p = params["nin_p"], params["nout_p"]
    block_k, nout = params["block_k"], params["nout"]

    vmem_cap, num_tc, _ = _chip_info()
    budget = _tile_budget(vmem_cap)
    x_bytes = x.dtype.itemsize
    out_bytes = jnp.dtype(out_dtype).itemsize
    ksplit = block_k != nin_p
    grid_k = nin_p // block_k

    # ---- output-feature tile ----
    if params["weight_resident"] and not ksplit:
        block_n = nout_p                       # weight-stationary: W DMA'd once
    else:
        block_n = 128
        for cand in (512, 256):
            if nout_p % cand == 0 and 2 * block_k * cand * 2 <= budget // 2:
                block_n = cand
                break
    grid_n = nout_p // block_n

    # ---- batch tile, sized from the VMEM budget (nin-aware) ----
    w_bufs = 1 if (grid_n == 1 and grid_k == 1) else 2
    fixed = w_bufs * block_k * block_n * 2 + 2 * block_n * 4
    per_row = (2 * block_k * x_bytes + 2 * block_n * out_bytes
               + (block_n * 4 if ksplit else 0))
    bmax = max(8, (budget - fixed) // per_row) // 8 * 8

    force_split = num_tc >= 2                  # keep both v7x TensorCores busy
    if bmax >= B and B <= 2048 and not (force_split and grid_n == 1):
        block_b, B_p, grid_b = B, B, 1         # one full-dim block: no batch pad
    else:
        cap = min(bmax, 512)
        if force_split and grid_n == 1:
            cap = min(cap, _round_up(max(1, (B + 1) // 2), 8))
        cands = {max(8, cap // 8 * 8)}
        for c in (512, 384, 256, 128):         # MXU-friendly aligned candidates
            if c <= cap:
                cands.add(c)
        # smallest padded batch wins; ties -> bigger tile
        block_b = min(sorted(cands), key=lambda c: (_round_up(B, c), -c))
        B_p = _round_up(B, block_b)
        grid_b = B_p // block_b
    if force_split and grid_b * grid_n == 1 and nout_p >= 256:
        block_n, grid_n = nout_p // 2, 2       # tiny batch: split N across cores
    w_bufs = 1 if (grid_n == 1 and grid_k == 1) else 2
    x_bufs = 1 if (grid_b == 1 and grid_k == 1) else 2

    # ---- grid ordering: minimize re-streamed HBM bytes ----
    if grid_b > 1 and grid_n > 1:
        batch_outer = (grid_b * (nin_p * nout_p * 2)
                       <= grid_n * (B_p * nin_p * x_bytes))
    else:
        batch_outer = True

    def _spec(shape, imap, bufs):
        if bufs == 1:   # block index constant over the grid -> single buffer
            return pl.BlockSpec(shape, imap,
                                pipeline_mode=pl.Buffered(buffer_count=1))
        return pl.BlockSpec(shape, imap)

    if ksplit:
        if batch_outer:
            grid = (grid_b, grid_n, grid_k)
            xm, wm = (lambda i, j, k: (i, k)), (lambda i, j, k: (k, j))
            sm, om = (lambda i, j, k: (0, j)), (lambda i, j, k: (i, j))
        else:
            grid = (grid_n, grid_b, grid_k)
            xm, wm = (lambda j, i, k: (i, k)), (lambda j, i, k: (k, j))
            sm, om = (lambda j, i, k: (0, j)), (lambda j, i, k: (i, j))
        dims = ("parallel", "parallel", "arbitrary")
        kernel = _fce_kernel_ksplit
        scratch = (pltpu.VMEM((block_b, block_n), jnp.float32),)
    else:
        if batch_outer:
            grid = (grid_b, grid_n)
            xm, wm = (lambda i, j: (i, 0)), (lambda i, j: (0, j))
            sm, om = (lambda i, j: (0, j)), (lambda i, j: (i, j))
        else:
            grid = (grid_n, grid_b)
            xm, wm = (lambda j, i: (i, 0)), (lambda j, i: (0, j))
            sm, om = (lambda j, i: (0, j)), (lambda j, i: (i, j))
        dims = ("parallel", "parallel")
        kernel = _fce_kernel
        scratch = ()

    xp = x
    if B_p != B or nin_p != nin:
        # TODO(synk): per-call pad pass over x; only hit for ragged batch tiles
        #             or the (rare) K-split path.
        xp = jnp.pad(x, ((0, B_p - B), (0, nin_p - nin)))

    # Upper-bound VMEM estimate (2 buffers everywhere) -> explicit scoped limit
    # (v5e's 16-MiB default would otherwise reject the larger tiles).
    needed_ub = (2 * block_b * block_k * x_bytes + 2 * block_k * block_n * 2
                 + 2 * block_b * block_n * out_bytes + 2 * block_n * 4
                 + (block_b * block_n * 4 if ksplit else 0))
    vmem_limit = int(min(vmem_cap * 7 // 8, needed_ub * 5 // 4 + 8 * _MiB))

    cost = pl.CostEstimate(
        flops=2 * B_p * nin_p * nout_p,
        transcendentals=0,
        bytes_accessed=int(B_p * nin_p * x_bytes + nin_p * nout_p * 2
                           + B_p * nout_p * out_bytes + nout_p * 4))

    out = pl.pallas_call(
        kernel,
        out_shape=jax.ShapeDtypeStruct((B_p, nout_p), out_dtype),
        grid_spec=pltpu.PrefetchScalarGridSpec(
            num_scalar_prefetch=0,
            grid=grid,
            in_specs=[
                _spec((block_b, block_k), xm, x_bufs),
                _spec((block_k, block_n), wm, w_bufs),
                pl.BlockSpec((1, block_n), sm),
            ],
            out_specs=pl.BlockSpec((block_b, block_n), om),
            scratch_shapes=scratch,
        ),
        compiler_params=pltpu.CompilerParams(
            dimension_semantics=dims, vmem_limit_bytes=vmem_limit),
        cost_estimate=cost,
    )(xp, wt, shift)

    if B_p != B or nout_p != nout:
        out = out[:B, :nout]
    return out


def fully_connected_embed(x, weight, bias, gamma, beta, running_mean,
                          running_var, eps=1e-5, out_dtype=jnp.bfloat16,
                          compute_dtype=jnp.bfloat16):
    """Convenience one-shot wrapper (prefer prepare_... + ..._apply in a loop)."""
    params = prepare_fully_connected_embed(weight, bias, gamma, beta,
                                           running_mean, running_var, eps,
                                           compute_dtype)
    return fully_connected_embed_apply(x, params, out_dtype=out_dtype)


if __name__ == "__main__":
    # Small shapes consistent with the module: batch=16, nin=64, nout=32.
    B, nin, nout = 16, 64, 32
    key = jax.random.PRNGKey(0)
    kx, kw, kb = jax.random.split(key, 3)

    x = jax.random.normal(kx, (B, nin), dtype=jnp.float32)

    # nn.Linear default init: U(-1/sqrt(nin), 1/sqrt(nin)) for weight and bias.
    bound = 1.0 / (nin ** 0.5)
    weight = jax.random.uniform(kw, (nout, nin), minval=-bound, maxval=bound,
                                dtype=jnp.float32)
    bias = jax.random.uniform(kb, (nout,), minval=-bound, maxval=bound,
                              dtype=jnp.float32)

    # nn.BatchNorm1d default params / running stats (eval mode).
    gamma = jnp.ones((nout,), jnp.float32)
    beta = jnp.zeros((nout,), jnp.float32)
    running_mean = jnp.zeros((nout,), jnp.float32)
    running_var = jnp.ones((nout,), jnp.float32)

    # Prepare once (cached, per-call wrapper passes eliminated), apply.
    params = prepare_fully_connected_embed(weight, bias, gamma, beta,
                                           running_mean, running_var)
    out = fully_connected_embed_apply(x, params)
    out = jax.block_until_ready(out)
    assert out.shape == (B, nout)

    # Pure-JAX f32 reference (same eval-mode semantics). The kernel uses bf16
    # MXU operands and bf16 output, so compare with a bf16-appropriate tolerance.
    ref = x @ weight.T + bias
    ref = (ref - running_mean) / jnp.sqrt(running_var + 1e-5) * gamma + beta
    ref = jnp.maximum(ref, 0.0)
    out_f32 = out.astype(jnp.float32)
    max_err = float(jnp.max(jnp.abs(out_f32 - ref)))
    assert jnp.allclose(out_f32, ref, atol=3e-2, rtol=3e-2), max_err

    print("KERNEL_OK")
</pallas_src>

<mosaic_0001>
module attributes {stable_mosaic.version = 11 : i64} {
  func.func @_fce_kernel(%arg0: i32, %arg1: i32, %arg2: memref<16x64xf32, #tpu.memory_space<vmem>>, %arg3: memref<64x128xbf16, #tpu.memory_space<vmem>>, %arg4: memref<1x128xf32, #tpu.memory_space<vmem>>, %arg5: memref<16x128xbf16, #tpu.memory_space<vmem>>) attributes {dimension_semantics = [#tpu.dimension_semantics<parallel>, #tpu.dimension_semantics<parallel>], iteration_bounds = array<i64: 1, 1>, scalar_prefetch = 0 : i64, scratch_operands = 0 : i64, tpu.core_type = #tpu.core_type<tc>, window_params = [{pipeline_mode = #tpu.pipeline_mode<synchronous>, transform_indices = @transform_0, window_bounds = array<i64: 16, 64>}, {pipeline_mode = #tpu.pipeline_mode<synchronous>, transform_indices = @transform_1, window_bounds = array<i64: 64, 128>}, {transform_indices = @transform_2, window_bounds = array<i64: 1, 128>}, {transform_indices = @transform_3, window_bounds = array<i64: 16, 128>}]} {
    %c0 = arith.constant 0 : index
    %c0_0 = arith.constant 0 : index
    %0 = vector.load %arg2[%c0, %c0_0] : memref<16x64xf32, #tpu.memory_space<vmem>>, vector<16x64xf32>
    %1 = arith.truncf %0 : vector<16x64xf32> to vector<16x64xbf16>
    %c0_1 = arith.constant 0 : index
    %c0_2 = arith.constant 0 : index
    %2 = vector.load %arg3[%c0_1, %c0_2] : memref<64x128xbf16, #tpu.memory_space<vmem>>, vector<64x128xbf16>
    %cst = arith.constant dense<0.000000e+00> : vector<16x128xf32>
    %3 = tpu.matmul %1, %2, %cst {dimension_numbers = #tpu.dot_dimension_numbers<[1], [0], [0], [1], [0, 0, 1, 1], [], []>} : vector<16x64xbf16>, vector<64x128xbf16>, vector<16x128xf32> -> vector<16x128xf32>
    %c0_3 = arith.constant 0 : index
    %c0_4 = arith.constant 0 : index
    %4 = vector.load %arg4[%c0_3, %c0_4] : memref<1x128xf32, #tpu.memory_space<vmem>>, vector<1x128xf32>
    %5 = vector.broadcast %4 : vector<1x128xf32> to vector<16x128xf32>
    %6 = arith.addf %3, %5 : vector<16x128xf32>
    %cst_5 = arith.constant 0.000000e+00 : f32
    %7 = vector.broadcast %cst_5 : f32 to vector<16x128xf32>
    %8 = arith.maximumf %6, %7 : vector<16x128xf32>
    %9 = arith.truncf %8 : vector<16x128xf32> to vector<16x128xbf16>
    %c0_6 = arith.constant 0 : index
    %c0_7 = arith.constant 0 : index
    %10 = vector.load %arg5[%c0_6, %c0_7] : memref<16x128xbf16, #tpu.memory_space<vmem>>, vector<16x128xbf16>
    tpu.vector_store %arg5[%c0_6, %c0_7], %9 {strides = array<i32>} : memref<16x128xbf16, #tpu.memory_space<vmem>>, vector<16x128xbf16>,
    return
  }
  func.func @transform_0(%arg0: i32, %arg1: i32) -> (i32, i32) {
    %c0_i32 = arith.constant 0 : i32
    %c0_i32_0 = arith.constant 0 : i32
    return %arg0, %c0_i32 : i32, i32
  }
  func.func @transform_1(%arg0: i32, %arg1: i32) -> (i32, i32) {
    %c0_i32 = arith.constant 0 : i32
    %c0_i32_0 = arith.constant 0 : i32
    return %c0_i32, %arg1 : i32, i32
  }
  func.func @transform_2(%arg0: i32, %arg1: i32) -> (i32, i32) {
    %c0_i32 = arith.constant 0 : i32
    %c0_i32_0 = arith.constant 0 : i32
    return %c0_i32, %arg1 : i32, i32
  }
  func.func @transform_3(%arg0: i32, %arg1: i32) -> (i32, i32) {
    %c0_i32 = arith.constant 0 : i32
    return %arg0, %arg1 : i32, i32
  }
}

</mosaic_0001>

<bundles_post_ra>
// kernel: tpu_custom_call.1
= control target key start
LH: loop header
LB: loop body
LE: loop exit
PB: predicated region body
PF: predicated region fallthrough
CT: control target
= control target key end

     0   :  { %8 = vsyncpa [#allocation3], 0  ;;  %s352_s0 = inlined_call_operand.hbm [shape: f32[16,64], index: 0, kind: input, shape index: {}]   ;;  %s353_s1 = inlined_call_operand.hbm [shape: bf16[64,128], index: 1, kind: input, shape index: {}]   ;;  %s354_s2 = inlined_call_operand.vmem [shape: f32[1,128], index: 2, kind: input, shape index: {}]   ;;  %s355_s3 = inlined_call_operand.hbm [shape: bf16[16,128], index: 3, kind: output, shape index: {}]  }
   0x1   :  { %9 = vsyncpa [#allocation6], 0 }
   0x2   :  { %10 = vsyncpa [#allocation4], 0  ;;  %s278_s12 = smov [#allocation2]   ;;  %s206_s16 = scalar_lea.hbm %s352_s0, 256 }
   0x3   :  { %s16_s13 = sshll.u32 %s278_s12, 4  ;;  %p207_p0 = scmp.ne.s32.totalorder %s352_s0, %s206_s16  ;;  %s17_s13 = int_to_ptr.vmem [resolvable:$true] %s16_s13 }
   0x4   :  { %p210_p1 = scmp.lt.u32.totalorder %s206_s16, %s352_s0 }
   0x6   :  { %p212_p2 = pnand %p210_p1, %p207_p0 }
   0x8   :  { %215 = shalt.err (!%p212_p2)
}
   0x9   :  { %s216_s21 = scalar_lea.vmem %s17_s13, 256  ;;  %p221_p4 = scmp.lt.s32.totalorder %s17_s13, %s17_s13 }
   0xa   :  { %p217_p3 = scmp.ne.s32.totalorder %s17_s13, %s216_s21  ;;  %p222_p5 = scmp.lt.s32.totalorder %s216_s21, %s216_s21 }
   0xc   :  { %p223_p6 = por %p222_p5, %p221_p4 }
   0xe   :  { %p224_p7 = pnand %p223_p6, %p217_p3 }
  0x10   :  { %227 = shalt.err (!%p224_p7)
}
  0x11   :  { %s279_s22 = smov 128   ;;  %s280_s23 = smov 8  }
  0x12   :  { %22 = dma.hbm_to_vmem [thread:$0]  %s352_s0, 256, %s17_s13, [#allocation3], %s279_s22, %s279_s22, %s280_s23  }
  0x13   :  { %s281_s26 = smov [#allocation5]   ;;  %s228_s30 = scalar_lea.hbm %s353_s1, 512 }
  0x14   :  { %s28_s27 = sshll.u32 %s281_s26, 4  ;;  %p229_p8 = scmp.ne.s32.totalorder %s353_s1, %s228_s30  ;;  %s29_s27 = int_to_ptr.vmem [resolvable:$true] %s28_s27 }
  0x15   :  { %p232_p9 = scmp.lt.u32.totalorder %s228_s30, %s353_s1 }
  0x17   :  { %p234_p10 = pnand %p232_p9, %p229_p8 }
  0x19   :  { %237 = shalt.err (!%p234_p10)
}
  0x1a   :  { %s238_s8 = scalar_lea.vmem %s29_s27, 512  ;;  %p243_p12 = scmp.lt.s32.totalorder %s29_s27, %s29_s27 }
  0x1b   :  { %p239_p11 = scmp.ne.s32.totalorder %s29_s27, %s238_s8  ;;  %p244_p13 = scmp.lt.s32.totalorder %s238_s8, %s238_s8 }
  0x1d   :  { %p245_p0 = por %p244_p13, %p243_p12 }
  0x1f   :  { %p246_p1 = pnand %p245_p0, %p239_p11 }
  0x21   :  { %249 = shalt.err (!%p246_p1)
}
  0x22   :  { %s282_s0 = smov 64   ;;  %s283_s9 = smov 4  }
  0x23   :  { %34 = dma.hbm_to_vmem [thread:$0]  %s353_s1, 512, %s29_s27, [#allocation6], %s282_s0, %s282_s0, %s283_s9  }
  0x24   :  { %272 = dma.done.wait [#allocation3], 256  }
  0x25   :  { %273 = vsyncadd [#allocation3], 4294967040 }
  0x26   :  { %274 = dma.done.wait [#allocation6], 512  }
  0x27   :  { %275 = vsyncadd [#allocation6], 4294966784  ;;  %v284_v0 = vmov 0.0   ;;  %vm285_vm0 = vmmov 0   ;;  %v202_v1 = vld [vmem:[#allocation5] sm:$0xff]   ;;  %v203_v2 = vld [vmem:[#allocation5 + $0x8] sm:$0xff]  }
  0x28   :  { %181 = vmatprep.subr.bf16.mxu0 %v284_v0  ;;  %189 = vmatprep.mubr.msk.bf16.mxu0 %vm285_vm0, %v284_v0  ;;  %v204_v3 = vld [vmem:[#allocation5 + $0x10] sm:$0xff]   ;;  %v205_v4 = vld [vmem:[#allocation5 + $0x18] sm:$0xff]   ;;  %vm86_vm1 = vcmask 523264   ;;  %s286_s13 = smov [#allocation7]  }
  0x29   :  { %182 = vmatpush3.bf16.msra.mxu0 %v202_v1  ;;  %v44_v5 = vld [vmem:[#allocation2] sm:$0xff]  ;;  %v45_v6 = vld [vmem:[#allocation2 + $0x8] sm:$0xff]  ;;  %s148_s14 = sshll.u32 %s286_s13, 4  ;;  %s149_s14 = int_to_ptr.vmem [resolvable:$true] %s148_s14 }
  0x2a   :  { %183 = vmatprep.subr.bf16.mxu0 %v284_v0  ;;  %v46_v7 = vpack.c.bf16 %v45_v6, %v44_v5  ;;  %v161_v8 = vld [vmem:[%s354_s2] ss:$0 sm:$0xff]  ;;  %s250_s15 = scalar_lea.vmem %s149_s14, 128  ;;  %p255_p3 = scmp.lt.s32.totalorder %s149_s14, %s149_s14 }
  0x2b   :  { %p251_p2 = scmp.ne.s32.totalorder %s149_s14, %s250_s15  ;;  %p256_p4 = scmp.lt.s32.totalorder %s250_s15, %s250_s15 }
  0x2d   :  { %184 = vmatpush3.bf16.msra.mxu0 %v203_v2  ;;  %p257_p5 = por %p256_p4, %p255_p3 }
  0x2e   :  { %185 = vmatprep.subr.bf16.mxu0 %v284_v0 }
  0x2f   :  { %p258_p6 = pnand %p257_p5, %p251_p2 }
  0x31   :  { %186 = vmatpush3.bf16.msra.mxu0 %v204_v3 }
  0x32   :  { %187 = vmatprep.subr.bf16.mxu0 %v284_v0 }
  0x35   :  { %188 = vmatpush3.bf16.msra.mxu0 %v205_v4 }
  0x38   :  { %190 = vmatmul.mubr.msk.bf16.vlgmr.msra.gmra.mrb[0].mxu0 %vm86_vm1, %v46_v7 }
 0x10b   :  { %v124_v9 = vpop.f32.mrb[0].mxu0 }
 0x10c   :  { %v125_v10 = vadd.f32 %v161_v8, %v124_v9  ;;  %v191_v11 = vpop.f32.mrb[1].mxu0 }
 0x10d   :  { %v127_v12 = vpop.f32.mrb[2].mxu0 }
 0x10e   :  { %v128_v13 = vadd.f32 %v161_v8, %v127_v12  ;;  %v192_v14 = vpop.f32.mrb[3].mxu0  ;;  %v131_v15 = vmax.f32 %v125_v10, 0.0 }
 0x110   :  { %v132_v16 = vmax.f32 %v128_v13, 0.0 }
 0x112   :  { %v174_v17 = vpack.c.bf16 %v132_v16, %v131_v15 }
 0x114   :  { %175 = vst [vmem:[#allocation7] sm:$0xff] %v174_v17  }
 0x115   :  { %261 = shalt.err (!%p258_p6)
}
 0x116   :  { %s262_s17 = scalar_lea.hbm %s355_s3, 128 }
 0x117   :  { %p263_p7 = scmp.ne.s32.totalorder %s355_s3, %s262_s17  ;;  %p266_p8 = scmp.lt.u32.totalorder %s262_s17, %s355_s3 }
 0x119   :  { %p268_p9 = pnand %p266_p8, %p263_p7 }
 0x11b   :  { %271 = shalt.err (!%p268_p9)
}
 0x11c   :  { %154 = dma.vmem_to_hbm [thread:$0]  %s149_s14, 128, %s355_s3, [#allocation4], %s282_s0, %s282_s0, %s283_s9  }
 0x11d   :  { %276 = dma.done.wait [#allocation4], 128  }
 0x11e   :  { %277 = vsyncadd [#allocation4], 4294967168 }
 0x11f   :  { %158 = vsyncpa [#allocation3], 1 }
 0x120   :  { %159 = vsyncpa [#allocation6], 1 }
 0x121   :  { %160 = vsyncpa [#allocation4], 1 }

</bundles_post_ra>
